<compile_context>
chip_gen: v7x
topology: tpu7x:2x2x1
jax: 0.10.0
libtpu: 0.0.40
codegen_flags: <defaults>
</compile_context>

<pallas_src>
import jax
import jax.numpy as jnp
from jax import lax
from jax.experimental import pallas as pl
from jax.experimental.pallas import tpu as pltpu


def _reg_weighted_l1_kernel(feat_ref,   # VMEM (C, THW)  per-(batch, hw-tile) block
                            mask_ref,   # VMEM (C, K)    per-batch block
                            tgt_ref,    # VMEM (C, K)    per-batch block
                            ind_ref,    # VMEM (1, K)    per-batch block, int32
                            lsum_ref,   # VMEM (1, 1)    per-batch |diff| sum
                            msum_ref,   # VMEM (1, 1)    per-batch mask sum
                            pred_acc):  # VMEM (C, K)    f32 gather accumulator
    h = pl.program_id(1)
    thw = feat_ref.shape[1]
    k = mask_ref.shape[1]

    @pl.when(h == 0)
    def _():
        pred_acc[...] = jnp.zeros_like(pred_acc)

    # Vectorized gather of this HW tile: one-hot(ind) from a 2-D iota,
    # contracted against the (C, THW) feature tile on the MXU. Indices that
    # fall outside this tile (or outside [0, HW)) contribute exactly zero.
    base = h * thw
    pos = lax.broadcasted_iota(jnp.int32, (thw, k), 0) + base      # (THW, K)
    onehot = (pos == ind_ref[...]).astype(jnp.float32)             # (THW, K)
    pred_acc[...] += jnp.dot(feat_ref[...], onehot,
                             preferred_element_type=jnp.float32)   # (C, K)

    # On the last HW tile pred is complete: fused masked-L1 partial sums.
    @pl.when(h == pl.num_programs(1) - 1)
    def _():
        m = mask_ref[...]
        diff = (pred_acc[...] - tgt_ref[...]) * m
        lsum_ref[...] = jnp.full((1, 1), jnp.sum(jnp.abs(diff)), jnp.float32)
        msum_ref[...] = jnp.full((1, 1), jnp.sum(m), jnp.float32)


def _pick_hw_tile(hw, max_tile=2048):
    """Largest HW tile <= max_tile that divides HW (keeps feat block + one-hot small)."""
    if hw <= max_tile:
        return hw
    for t in (2048, 1024, 512, 256, 128):
        if hw % t == 0:
            return t
    # TODO(synk): ragged HW (not a multiple of 128) falls back to a single tile.
    return hw


def reg_weighted_l1_loss(output, mask, ind, target):
    """output: (B, C, H, W); mask/target: (B, K, C); ind: (B, K) int in [0, H*W)."""
    B, C, H, W = output.shape
    K = ind.shape[1]
    HW = H * W
    THW = _pick_hw_tile(HW)
    n_hw = HW // THW

    # Lane-dense, transpose-free layouts:
    #   feat (B, C, HW)      -- pure reshape of NCHW (no extra HBM transpose pass)
    #   mask/target (B, C, K) -- tiny transpose; keeps K on the lane axis
    feat = output.reshape(B, C, HW).astype(jnp.float32)
    mask_ck = jnp.transpose(mask.astype(jnp.float32), (0, 2, 1))
    tgt_ck = jnp.transpose(target.astype(jnp.float32), (0, 2, 1))
    ind_v = ind.astype(jnp.int32).reshape(B, 1, K)

    grid_spec = pltpu.PrefetchScalarGridSpec(
        num_scalar_prefetch=0,
        grid=(B, n_hw),
        in_specs=[
            pl.BlockSpec((None, C, THW), lambda b, h: (b, 0, h)),
            pl.BlockSpec((None, C, K), lambda b, h: (b, 0, 0)),
            pl.BlockSpec((None, C, K), lambda b, h: (b, 0, 0)),
            pl.BlockSpec((None, 1, K), lambda b, h: (b, 0, 0)),
        ],
        out_specs=[
            pl.BlockSpec((None, 1, 1), lambda b, h: (b, 0, 0)),
            pl.BlockSpec((None, 1, 1), lambda b, h: (b, 0, 0)),
        ],
        scratch_shapes=[pltpu.VMEM((C, K), jnp.float32)],
    )

    lsum, msum = pl.pallas_call(
        _reg_weighted_l1_kernel,
        out_shape=(jax.ShapeDtypeStruct((B, 1, 1), jnp.float32),
                   jax.ShapeDtypeStruct((B, 1, 1), jnp.float32)),
        grid_spec=grid_spec,
        compiler_params=pltpu.CompilerParams(
            dimension_semantics=("parallel", "arbitrary")),
    )(feat, mask_ck, tgt_ck, ind_v)

    return jnp.sum(lsum) / (jnp.sum(msum) + jnp.float32(1e-4))


def _reference(output, mask, ind, target):
    B, C, H, W = output.shape
    feat = jnp.transpose(output, (0, 2, 3, 1)).reshape(B, H * W, C)
    pred = jnp.take_along_axis(feat, ind[:, :, None].astype(jnp.int32), axis=1)
    mask = mask.astype(jnp.float32)
    target = target.astype(jnp.float32)
    num = jnp.sum(jnp.abs(pred * mask - target * mask))
    return num / (jnp.sum(mask) + 1e-4)


if __name__ == "__main__":
    B, C, H, W, K = 2, 4, 16, 16, 8

    key = jax.random.PRNGKey(0)
    k1, k2, k3, k4 = jax.random.split(key, 4)

    output = jax.random.normal(k1, (B, C, H, W), dtype=jnp.float32)
    target = jax.random.normal(k2, (B, K, C), dtype=jnp.float32)
    ind = jax.random.randint(k3, (B, K), 0, H * W, dtype=jnp.int32)
    # 0/1 mask (as CenterNet supplies), float after .float() in forward.
    mask = jax.random.bernoulli(k4, p=0.7, shape=(B, K, C)).astype(jnp.float32)

    loss = reg_weighted_l1_loss(output, mask, ind, target)
    loss = jax.block_until_ready(loss)

    ref = _reference(output, mask, ind, target)
    assert jnp.allclose(loss, ref, rtol=1e-5, atol=1e-5), (loss, ref)

    print("KERNEL_OK")
</pallas_src>

<mosaic_0001>
module attributes {stable_mosaic.version = 11 : i64} {
  func.func @_reg_weighted_l1_kernel(%arg0: i32, %arg1: i32, %arg2: memref<1x4x256xf32, #tpu.memory_space<vmem>>, %arg3: memref<1x4x8xf32, #tpu.memory_space<vmem>>, %arg4: memref<1x4x8xf32, #tpu.memory_space<vmem>>, %arg5: memref<1x1x8xi32, #tpu.memory_space<vmem>>, %arg6: memref<1x1x1xf32, #tpu.memory_space<vmem>>, %arg7: memref<1x1x1xf32, #tpu.memory_space<vmem>>, %arg8: memref<4x8xf32, #tpu.memory_space<vmem>>) attributes {dimension_semantics = [#tpu.dimension_semantics<parallel>, #tpu.dimension_semantics<arbitrary>], iteration_bounds = array<i64: 2, 1>, scalar_prefetch = 0 : i64, scratch_operands = 1 : i64, tpu.core_type = #tpu.core_type<tc>, window_params = [{transform_indices = @transform_0, window_bounds = array<i64: 1, 4, 256>}, {transform_indices = @transform_1, window_bounds = array<i64: 1, 4, 8>}, {transform_indices = @transform_2, window_bounds = array<i64: 1, 4, 8>}, {transform_indices = @transform_3, window_bounds = array<i64: 1, 1, 8>}, {transform_indices = @transform_4, window_bounds = array<i64: 1, 1, 1>}, {transform_indices = @transform_5, window_bounds = array<i64: 1, 1, 1>}]} {
    %c0_i32 = arith.constant 0 : i32
    %0 = arith.cmpi eq, %arg1, %c0_i32 : i32
    %1 = arith.extui %0 : i1 to i32
    %c0_i32_0 = arith.constant 0 : i32
    %2 = arith.cmpi ne, %1, %c0_i32_0 : i32
    scf.if %2 {
      %cst_12 = arith.constant 0.000000e+00 : f32
      %22 = vector.broadcast %cst_12 : f32 to vector<4x8xf32>
      %c0_13 = arith.constant 0 : index
      %c0_14 = arith.constant 0 : index
      %23 = vector.load %arg8[%c0_13, %c0_14] : memref<4x8xf32, #tpu.memory_space<vmem>>, vector<4x8xf32>
      tpu.vector_store %arg8[%c0_13, %c0_14], %22 {strides = array<i32>} : memref<4x8xf32, #tpu.memory_space<vmem>>, vector<4x8xf32>,
    } else {
    }
    %c256_i32 = arith.constant 256 : i32
    %3 = arith.muli %arg1, %c256_i32 : i32
    %4 = tpu.iota {dimensions = array<i32: 0>} : vector<256x8xi32>
    %5 = vector.broadcast %3 : i32 to vector<256x8xi32>
    %6 = arith.addi %4, %5 : vector<256x8xi32>
    %c0 = arith.constant 0 : index
    %c0_1 = arith.constant 0 : index
    %c0_2 = arith.constant 0 : index
    %7 = vector.load %arg5[%c0, %c0_1, %c0_2] : memref<1x1x8xi32, #tpu.memory_space<vmem>>, vector<1x1x8xi32>
    %8 = vector.shape_cast %7 : vector<1x1x8xi32> to vector<1x8xi32>
    %9 = vector.broadcast %8 : vector<1x8xi32> to vector<256x8xi32>
    %10 = arith.cmpi eq, %6, %9 : vector<256x8xi32>
    %11 = arith.extui %10 : vector<256x8xi1> to vector<256x8xi32>
    %12 = arith.sitofp %11 : vector<256x8xi32> to vector<256x8xf32>
    %c0_3 = arith.constant 0 : index
    %c0_4 = arith.constant 0 : index
    %13 = vector.load %arg8[%c0_3, %c0_4] : memref<4x8xf32, #tpu.memory_space<vmem>>, vector<4x8xf32>
    %c0_5 = arith.constant 0 : index
    %c0_6 = arith.constant 0 : index
    %c0_7 = arith.constant 0 : index
    %14 = vector.load %arg2[%c0_5, %c0_6, %c0_7] : memref<1x4x256xf32, #tpu.memory_space<vmem>>, vector<1x4x256xf32>
    %15 = vector.shape_cast %14 : vector<1x4x256xf32> to vector<4x256xf32>
    %cst = arith.constant dense<0.000000e+00> : vector<4x8xf32>
    %16 = tpu.matmul %15, %12, %cst {dimension_numbers = #tpu.dot_dimension_numbers<[1], [0], [0], [1], [0, 0, 1, 1], [], []>} : vector<4x256xf32>, vector<256x8xf32>, vector<4x8xf32> -> vector<4x8xf32>
    %17 = arith.addf %13, %16 : vector<4x8xf32>
    %c0_8 = arith.constant 0 : index
    %c0_9 = arith.constant 0 : index
    %18 = vector.load %arg8[%c0_8, %c0_9] : memref<4x8xf32, #tpu.memory_space<vmem>>, vector<4x8xf32>
    tpu.vector_store %arg8[%c0_8, %c0_9], %17 {strides = array<i32>} : memref<4x8xf32, #tpu.memory_space<vmem>>, vector<4x8xf32>,
    %c0_i32_10 = arith.constant 0 : i32
    %19 = arith.cmpi eq, %arg1, %c0_i32_10 : i32
    %20 = arith.extui %19 : i1 to i32
    %c0_i32_11 = arith.constant 0 : i32
    %21 = arith.cmpi ne, %20, %c0_i32_11 : i32
    scf.if %21 {
      %c0_12 = arith.constant 0 : index
      %c0_13 = arith.constant 0 : index
      %c0_14 = arith.constant 0 : index
      %22 = vector.load %arg3[%c0_12, %c0_13, %c0_14] : memref<1x4x8xf32, #tpu.memory_space<vmem>>, vector<1x4x8xf32>
      %23 = vector.shape_cast %22 : vector<1x4x8xf32> to vector<4x8xf32>
      %c0_15 = arith.constant 0 : index
      %c0_16 = arith.constant 0 : index
      %24 = vector.load %arg8[%c0_15, %c0_16] : memref<4x8xf32, #tpu.memory_space<vmem>>, vector<4x8xf32>
      %c0_17 = arith.constant 0 : index
      %c0_18 = arith.constant 0 : index
      %c0_19 = arith.constant 0 : index
      %25 = vector.load %arg4[%c0_17, %c0_18, %c0_19] : memref<1x4x8xf32, #tpu.memory_space<vmem>>, vector<1x4x8xf32>
      %26 = vector.shape_cast %25 : vector<1x4x8xf32> to vector<4x8xf32>
      %27 = arith.subf %24, %26 : vector<4x8xf32>
      %28 = arith.mulf %27, %23 : vector<4x8xf32>
      %29 = math.absf %28 : vector<4x8xf32>
      %30 = vector.shape_cast %29 : vector<4x8xf32> to vector<1x4x8xf32>
      %cst_20 = arith.constant dense<0.000000e+00> : vector<1xf32>
      %31 = vector.multi_reduction <add>, %30, %cst_20 [1, 2] : vector<1x4x8xf32> to vector<1xf32>
      %32 = vector.shape_cast %31 : vector<1xf32> to vector<1x1x1xf32>
      %33 = vector.extract %32[0, 0, 0] : f32 from vector<1x1x1xf32>
      %34 = vector.broadcast %33 : f32 to vector<1x1xf32>
      %c0_21 = arith.constant 0 : index
      %c0_22 = arith.constant 0 : index
      %c0_23 = arith.constant 0 : index
      %35 = vector.load %arg6[%c0_21, %c0_22, %c0_23] : memref<1x1x1xf32, #tpu.memory_space<vmem>>, vector<1x1x1xf32>
      %36 = vector.shape_cast %35 : vector<1x1x1xf32> to vector<1x1xf32>
      %37 = vector.shape_cast %34 : vector<1x1xf32> to vector<1x1x1xf32>
      tpu.vector_store %arg6[%c0_21, %c0_22, %c0_23], %37 {strides = array<i32>} : memref<1x1x1xf32, #tpu.memory_space<vmem>>, vector<1x1x1xf32>,
      %38 = vector.shape_cast %23 : vector<4x8xf32> to vector<1x4x8xf32>
      %cst_24 = arith.constant dense<0.000000e+00> : vector<1xf32>
      %39 = vector.multi_reduction <add>, %38, %cst_24 [1, 2] : vector<1x4x8xf32> to vector<1xf32>
      %40 = vector.shape_cast %39 : vector<1xf32> to vector<1x1x1xf32>
      %41 = vector.extract %40[0, 0, 0] : f32 from vector<1x1x1xf32>
      %42 = vector.broadcast %41 : f32 to vector<1x1xf32>
      %c0_25 = arith.constant 0 : index
      %c0_26 = arith.constant 0 : index
      %c0_27 = arith.constant 0 : index
      %43 = vector.load %arg7[%c0_25, %c0_26, %c0_27] : memref<1x1x1xf32, #tpu.memory_space<vmem>>, vector<1x1x1xf32>
      %44 = vector.shape_cast %43 : vector<1x1x1xf32> to vector<1x1xf32>
      %45 = vector.shape_cast %42 : vector<1x1xf32> to vector<1x1x1xf32>
      tpu.vector_store %arg7[%c0_25, %c0_26, %c0_27], %45 {strides = array<i32>} : memref<1x1x1xf32, #tpu.memory_space<vmem>>, vector<1x1x1xf32>,
    } else {
    }
    return
  }
  func.func @transform_0(%arg0: i32, %arg1: i32) -> (i32, i32, i32) {
    %c0_i32 = arith.constant 0 : i32
    %c0_i32_0 = arith.constant 0 : i32
    return %arg0, %c0_i32, %arg1 : i32, i32, i32
  }
  func.func @transform_1(%arg0: i32, %arg1: i32) -> (i32, i32, i32) {
    %c0_i32 = arith.constant 0 : i32
    %c0_i32_0 = arith.constant 0 : i32
    %c0_i32_1 = arith.constant 0 : i32
    return %arg0, %c0_i32, %c0_i32_0 : i32, i32, i32
  }
  func.func @transform_2(%arg0: i32, %arg1: i32) -> (i32, i32, i32) {
    %c0_i32 = arith.constant 0 : i32
    %c0_i32_0 = arith.constant 0 : i32
    %c0_i32_1 = arith.constant 0 : i32
    return %arg0, %c0_i32, %c0_i32_0 : i32, i32, i32
  }
  func.func @transform_3(%arg0: i32, %arg1: i32) -> (i32, i32, i32) {
    %c0_i32 = arith.constant 0 : i32
    %c0_i32_0 = arith.constant 0 : i32
    %c0_i32_1 = arith.constant 0 : i32
    return %arg0, %c0_i32, %c0_i32_0 : i32, i32, i32
  }
  func.func @transform_4(%arg0: i32, %arg1: i32) -> (i32, i32, i32) {
    %c0_i32 = arith.constant 0 : i32
    %c0_i32_0 = arith.constant 0 : i32
    %c0_i32_1 = arith.constant 0 : i32
    return %arg0, %c0_i32, %c0_i32_0 : i32, i32, i32
  }
  func.func @transform_5(%arg0: i32, %arg1: i32) -> (i32, i32, i32) {
    %c0_i32 = arith.constant 0 : i32
    %c0_i32_0 = arith.constant 0 : i32
    %c0_i32_1 = arith.constant 0 : i32
    return %arg0, %c0_i32, %c0_i32_0 : i32, i32, i32
  }
}

</mosaic_0001>

<bundles_post_ra>
// kernel: tpu_custom_call.1
= control target key start
LH: loop header
LB: loop body
LE: loop exit
PB: predicated region body
PF: predicated region fallthrough
CT: control target
= control target key end

     0   :  { %s1505_s0 = inlined_call_operand.hbm [shape: f32[2,4,256], index: 0, kind: input, shape index: {}]   ;;  %s1506_s1 = inlined_call_operand.hbm [shape: f32[2,4,8], index: 1, kind: input, shape index: {}]   ;;  %s1507_s2 = inlined_call_operand.hbm [shape: f32[2,4,8], index: 2, kind: input, shape index: {}]   ;;  %s1508_s3 = inlined_call_operand.vmem [shape: s32[2,1,8], index: 3, kind: input, shape index: {}]   ;;  %s1509_s4 = inlined_call_operand.vmem [shape: f32[2,1,1], index: 4, kind: output, shape index: {0}]   ;;  %s1510_s5 = inlined_call_operand.vmem [shape: f32[2,1,1], index: 5, kind: output, shape index: {1}]  }
   0x1   :  { %1515 = sst [smem:[#allocation11_spill]] %s1506_s1 }
   0x2   :  { %11 = vsyncpa [#allocation4], 0 }
   0x3   :  { %13 = vsyncpa [#allocation4 + $0x1], 0 }
   0x4   :  { %14 = vsyncpa [#allocation6], 0 }
   0x5   :  { %16 = vsyncpa [#allocation6 + $0x1], 0  ;;  %s1186_s18 = smov 0   ;;  %s1188_s19 = smov 0  }
   0x6   :  { %s1190_s20 = smov 0   ;;  %s1192_s21 = smov 0  }
   0x7   :  { %s1194_s22 = smov 0   ;;  %s1196_s23 = smov 0  }
   0x8 LB: > { %s1512_s24 = sadd.s32 4294967295, %s1149_s23   ;;  %s34_s25 = sadd.s32 1, %s1145_s22  ;;  %s1149_s23 = sphi %s1196_s23, %s22_s23   ;;  %s1145_s22 = sphi %s1194_s22, %s1531_s22   ;;  %s1141_s21 = sphi %s1192_s21, %s1530_s21   ;;  %s1137_s20 = sphi %s1190_s20, %s1529_s20   ;;  %s1133_s19 = sphi %s1188_s19, %s1528_s19   ;;  %s1129_s18 = sphi %s1186_s18, %s1527_s18  }
   0x9   : > { %p36_p0 = scmp.ge.s32.totalorder %s34_s25, 2  ;;  %s43_s26 = sadd.s32 1, %s1137_s20 }
   0xa   : > { %p50_p1 = scmp.ne.s32.totalorder %s1137_s20, %s1133_s19  ;;  %p51_p2 = scmp.eq.s32.totalorder %s1149_s23, 0 }
   0xb   : > { %s1533_s25 = smov (%p36_p0, %s34_s25), 0  ;;  %p56_p4 = scmp.ne.s32.totalorder %s1133_s19, %s1129_s18 }
   0xc   : > { %1516 = sst [smem:[#allocation10_spill]] %s1533_s25  ;;  %p52_p3 = por %p51_p2, %p50_p1 }
   0xd   : > { %s38_s27 = ssub.s32 %s1145_s22, %s1533_s25  ;;  %p57_p5 = scmp.eq.s32.totalorder %s1512_s24, 0 }
   0xe   : > { %p41_p6 = scmp.eq.s32.totalorder %s38_s27, 0  ;;  %p953_p8 = scmp.lt.s32.totalorder %s1149_s23, 2 }
   0xf   : > { %p1227_p7 = por %p57_p5, %p56_p4  ;;  %s1236_s30 = sand.u32 1, %s1137_s20  }
  0x10   : > { %s1233_s29 = scalar_select %p41_p6, %s1137_s20, %s43_s26  }
  0x11   : > { %s1517_s28 = scalar_select %p1227_p7, 1, 0 }
  0x12   : > { %p1238_p9 = pnand %p953_p8, %p52_p3  ;;  %s231_s7 = sand.u32 1, %s1149_s23  }
  0x13   : > { %s790_s8 = sshll.u32 %s1236_s30, 2  ;;  %s791_s9 = sshll.u32 %s1145_s22, 6 }
  0x14   : > { %s1518_s6 = scalar_select %p1238_p9, 1, 0 }
  0x15   : > { %s1519_s1 = sld [smem:[#allocation11_spill]]  ;;  %s235_s13 = scalar_lea.vmem [#allocation5], %s790_s8 }
  0x16   : > { %s242_s14 = sshll.u32 %s235_s13, 4  ;;  %s1256_s15 = scalar_lea.sflag [#allocation6], %s231_s7  ;;  %s1254_s14 = int_to_ptr.vmem [resolvable:$true] %s242_s14 }
  0x17   : > { %p1262_p11 = pneg %p1238_p9 }
  0x1b   : > { %s1250_s12 = scalar_lea.hbm %s1519_s1, %s791_s9  ;;  %s1010_s27 = scalar_lea.hbm %s1519_s1, 128 }
  0x1c   : > { %s1005_s16 = scalar_lea.hbm %s1250_s12, 64  ;;  %p1011_p0 = scmp.lt.u32.totalorder %s1250_s12, %s1519_s1 }
  0x1d   : > { %p1006_p10 = scmp.ne.s32.totalorder %s1250_s12, %s1005_s16  ;;  %p1012_p1 = scmp.lt.u32.totalorder %s1010_s27, %s1005_s16 }
  0x1e   : > { %p1014_p3 = scmp.lt.u32.totalorder %s1005_s16, %s1250_s12 }
  0x1f   : > { %p1008_p12 = pnand %p1262_p11, %p1006_p10  ;;  %p1013_p2 = por %p1012_p1, %p1011_p0 }
  0x21   : > { %p1009_p13 = pneg %p1008_p12  ;;  %p1015_p4 = por %p1014_p3, %p1013_p2 }
  0x23   : > { %p1016_p5 = pnand %p1015_p4, %p1009_p13 }
  0x25   : > { %1019 = shalt.err (!%p1016_p5)
}
  0x26   : > { %s1020_s7 = scalar_lea.vmem %s1254_s14, 64  ;;  %s1151_s13 = smov [#allocation5]  }
  0x27   : > { %p1021_p6 = scmp.ne.s32.totalorder %s1254_s14, %s1020_s7  ;;  %s1025_s18 = sshll.u32 %s1151_s13, 4  ;;  %s1026_s18 = int_to_ptr.vmem [resolvable:$false] %s1025_s18 }
  0x28   : > { %s1027_s26 = scalar_lea.vmem %s1026_s18, 128  ;;  %p1028_p12 = scmp.lt.s32.totalorder %s1254_s14, %s1026_s18 }
  0x29   : > { %p1023_p8 = pnand %p1021_p6, %p1262_p11  ;;  %p1029_p7 = scmp.lt.s32.totalorder %s1027_s26, %s1020_s7 }
  0x2b   : > { %p1024_p10 = pneg %p1023_p8  ;;  %p1030_p0 = por %p1029_p7, %p1028_p12 }
  0x2d   : > { %p1031_p1 = pnand %p1030_p0, %p1024_p10 }
  0x2f   : > { %1034 = shalt.err (!%p1031_p1)
}
  0x30   : > { %949 = dma.hbm_to_vmem [thread:$0]  (!%p1238_p9), %s1250_s12, 64, %s1254_s14, %s1256_s15  }
  0x31   : > { %s1291_s10 = scalar_lea.hbm %s1507_s2, %s791_s9  ;;  %p794_p7 = scmp.ge.s32.totalorder %s1149_s23, 1 }
  0x32   : > { %p271_p13 = scmp.lt.s32.totalorder %s1149_s23, 3  ;;  %s787_s7 = sshll.u32 %s1236_s30, 3 }
  0x33   : > { %s865_s13 = sshll.u32 %s1145_s22, 7  ;;  %s214_s12 = scalar_lea.vmem [#allocation3], %s787_s7 }
  0x34   : > { %p1295_p2 = pnand %p794_p7, %p271_p13  ;;  %s1304_s24 = scalar_lea.hbm %s1505_s0, %s865_s13 }
  0x35   : > { %s224_s9 = sshll.u32 %s214_s12, 4  ;;  %s1310_s14 = scalar_lea.vmem [#allocation7], %s790_s8  ;;  %s1306_s9 = int_to_ptr.vmem [resolvable:$true] %s224_s9 }
  0x36   : > { %s1521_s11 = scalar_select %p1295_p2, 1, 0 }
  0x37   : > { %s260_s16 = sshll.u32 %s1310_s14, 4  ;;  %s211_s27 = scalar_lea.sflag [#allocation4], %s1236_s30  ;;  %s261_s16 = int_to_ptr.vmem [resolvable:$true] %s260_s16 }
  0x38   : > { %s1035_s1 = scalar_lea.hbm %s1304_s24, 128  ;;  %s1040_s26 = scalar_lea.hbm %s1505_s0, 256 }
  0x39   : > { %p1036_p3 = scmp.ne.s32.totalorder %s1304_s24, %s1035_s1  ;;  %p1041_p6 = scmp.lt.u32.totalorder %s1304_s24, %s1505_s0 }
  0x3a   : > { %p1042_p8 = scmp.lt.u32.totalorder %s1040_s26, %s1035_s1  ;;  %p1044_p12 = scmp.lt.u32.totalorder %s1035_s1, %s1304_s24 }
  0x3b   : > { %p1038_p4 = pnand %p1036_p3, %p1262_p11 }
  0x3c   : > { %p1043_p10 = por %p1042_p8, %p1041_p6 }
  0x3d   : > { %p1039_p5 = pneg %p1038_p4 }
  0x3e   : > { %p1045_p0 = por %p1044_p12, %p1043_p10 }
  0x40   : > { %p1046_p1 = pnand %p1045_p0, %p1039_p5 }
  0x42   : > { %1049 = shalt.err (!%p1046_p1)
}
  0x43   : > { %s1050_s30 = scalar_lea.vmem %s1306_s9, 128  ;;  %s1152_s8 = smov [#allocation3]  }
  0x44   : > { %p1051_p7 = scmp.ne.s32.totalorder %s1306_s9, %s1050_s30  ;;  %s1055_s12 = sshll.u32 %s1152_s8, 4  ;;  %s1056_s12 = int_to_ptr.vmem [resolvable:$false] %s1055_s12 }
  0x45   : > { %s1057_s25 = scalar_lea.vmem %s1056_s12, 256  ;;  %p1058_p4 = scmp.lt.s32.totalorder %s1306_s9, %s1056_s12 }
  0x46   : > { %p1053_p13 = pnand %p1051_p7, %p1262_p11  ;;  %p1059_p2 = scmp.lt.s32.totalorder %s1057_s25, %s1050_s30 }
  0x48   : > { %p1054_p3 = pneg %p1053_p13  ;;  %p1060_p6 = por %p1059_p2, %p1058_p4 }
  0x4a   : > { %p1061_p8 = pnand %p1060_p6, %p1054_p3 }
  0x4c   : > { %1064 = shalt.err (!%p1061_p8)
}
  0x4d   : > { %946 = dma.hbm_to_vmem [thread:$0]  (!%p1238_p9), %s1304_s24, 128, %s1306_s9, %s211_s27  }
  0x4e   : > { %s1065_s1 = scalar_lea.hbm %s1291_s10, 64  ;;  %s1070_s26 = scalar_lea.hbm %s1507_s2, 128 }
  0x4f   : > { %p1066_p5 = scmp.ne.s32.totalorder %s1291_s10, %s1065_s1  ;;  %p1071_p12 = scmp.lt.u32.totalorder %s1291_s10, %s1507_s2 }
  0x50   : > { %p1072_p0 = scmp.lt.u32.totalorder %s1070_s26, %s1065_s1  ;;  %p1074_p7 = scmp.lt.u32.totalorder %s1065_s1, %s1291_s10 }
  0x51   : > { %p1068_p10 = pnand %p1066_p5, %p1262_p11 }
  0x52   : > { %p1073_p1 = por %p1072_p0, %p1071_p12 }
  0x53   : > { %p1069_p2 = pneg %p1068_p10 }
  0x54   : > { %p1075_p13 = por %p1074_p7, %p1073_p1 }
  0x56   : > { %p1076_p3 = pnand %p1075_p13, %p1069_p2 }
  0x58   : > { %1079 = shalt.err (!%p1076_p3)
}
  0x59   : > { %s1080_s24 = scalar_lea.vmem %s261_s16, 64  ;;  %s1153_s9 = smov [#allocation7]  }
  0x5a   : > { %p1081_p4 = scmp.ne.s32.totalorder %s261_s16, %s1080_s24  ;;  %s1085_s14 = sshll.u32 %s1153_s9, 4  ;;  %s1086_s14 = int_to_ptr.vmem [resolvable:$false] %s1085_s14 }
  0x5b   : > { %s1087_s27 = scalar_lea.vmem %s1086_s14, 128  ;;  %p1088_p5 = scmp.lt.s32.totalorder %s261_s16, %s1086_s14 }
  0x5c   : > { %p1083_p6 = pnand %p1081_p4, %p1262_p11  ;;  %p1089_p10 = scmp.lt.s32.totalorder %s1087_s27, %s1080_s24 }
  0x5e   : > { %p1084_p8 = pneg %p1083_p6  ;;  %p1090_p9 = por %p1089_p10, %p1088_p5 }
  0x60   : > { %p1091_p0 = pnand %p1090_p9, %p1084_p8 }
  0x62   : > { %1094 = shalt.err (!%p1091_p0)
}
  0x63   : > { %p1522_p12 = scmp.ne.s32.totalorder %s1518_s6, 0  ;;  %p1523_p2 = scmp.ne.s32.totalorder %s1521_s11, 0 }
  0x64   : > { %s1358_s17 = sand.u32 (!%p1523_p2), 1, %s1133_s19   ;;  %p1524_p9 = scmp.ne.s32.totalorder (!%p1523_p2), %s1517_s28, 0 }
  0x65   : > { %952 = dma.hbm_to_vmem [thread:$0]  (!%p1522_p12), %s1291_s10, 64, %s261_s16, %s1256_s15  }
  0x66   : > { %275 = sbr.rel (%p1523_p2) target bundleno = 597 (0x255), region = 36  ;;  %s795_s8 = sshll.u32 (!%p1523_p2), %s1358_s17, 3 }
  0x67   : > { %s278_s12 = scalar_lea.sflag (!%p1523_p2), [#allocation4], %s1358_s17  ;;  %s1362_s25 = scalar_lea.vmem (!%p1523_p2), [#allocation3], %s795_s8 }
  0x6d   : > { %1120 = dma.done.wait (%p1524_p9), %s278_s12, 128  }
  0x6e   : > { %1122 = vsyncadd (%p1524_p9), %s278_s12, 4294967168  ;;  %s1525_s6 = sadd.s32 4294967295, %s1149_s23   ;;  %s796_s10 = sshll.u32 %s1358_s17, 2 }
  0x6f   : > { %s286_s15 = sand.u32 1, %s1525_s6   ;;  %s1373_s16 = scalar_lea.vmem [#allocation5], %s796_s10 }
  0x70   : > { %s287_s11 = scalar_lea.sflag [#allocation6], %s286_s15 }
  0x71   : > { %1124 = dma.done.wait (%p1524_p9), %s287_s11, 128  }
  0x72   : > { %1126 = vsyncadd (%p1524_p9), %s287_s11, 4294967168  ;;  %p341_p11 = scmp.lt.s32.totalorder %s1141_s21, 1  ;;  %v357_v0 = vlaneseq  ;;  %v1154_v14 = vmov 1.0|1.0   ;;  %v525_v21 = vld [vmem:[%s1362_s25] sm:$0xff]  ;;  %v1155_v37 = vmov 0.0  }
  0x73   : > { %v527_v26 = vcombine.high %v525_v21, %v525_v21  ;;  %s299_s28 = scalar_lea.vmem [#allocation7], %s796_s10  ;;  %v605_v44 = vld [vmem:[%s1373_s16] sm:$0xf] }
  0x74   : > { %s1535_s21 = smov (!%p341_p11, %s1141_s21), 1  ;;  %v1383_v1 = vshrl.u32 %v357_v0, 7  ;;  %v607_v43 = vld [vmem:[%s299_s28] sm:$0xf] }
  0x75   : > { %s343_s18 = scalar_lea.vmem %s1508_s3, %s1535_s21  ;;  %593 = vmatprep.mubr.f32.mxu0 %v527_v26  ;;  %s346_s30 = scalar_lea.vmem %s1509_s4, %s1535_s21 }
  0x76   : > { %v374_v2 = vadd.s32 128, %v1383_v1  ;;  %v375_v3 = vadd.s32 136, %v1383_v1  ;;  %v359_v4 = vadd.s32 8, %v1383_v1  ;;  %v376_v5 = vadd.s32 144, %v1383_v1  ;;  %v1398_v11 = vld [vmem:[%s343_s18] ss:$0 sm:$0xff]  ;;  %s349_s27 = scalar_lea.vmem %s1510_s5, %s1535_s21 }
  0x77   : > { %v377_v6 = vadd.s32 152, %v1383_v1  ;;  %v360_v7 = vadd.s32 16, %v1383_v1  ;;  %v361_v8 = vadd.s32 24, %v1383_v1  ;;  %v378_v9 = vadd.s32 160, %v1383_v1 }
  0x78   : > { %v379_v10 = vadd.s32 168, %v1383_v1  ;;  %v362_v12 = vadd.s32 32, %v1383_v1  ;;  %v363_v13 = vadd.s32 40, %v1383_v1  ;;  %vm444_vm0 = vcmp.eq.s32.totalorder %v374_v2, %v1398_v11 }
  0x79   : > { %vm445_vm1 = vcmp.eq.s32.totalorder %v375_v3, %v1398_v11  ;;  %vm428_vm2 = vcmp.eq.s32.totalorder %v1383_v1, %v1398_v11  ;;  %vm429_vm3 = vcmp.eq.s32.totalorder %v359_v4, %v1398_v11  ;;  %vm446_vm5 = vcmp.eq.s32.totalorder %v376_v5, %v1398_v11 }
  0x7a   : > { %vm901_vm4 = vmpackc.low %vm445_vm1, %vm444_vm0  ;;  %vm447_vm6 = vcmp.eq.s32.totalorder %v377_v6, %v1398_v11  ;;  %vm430_vm7 = vcmp.eq.s32.totalorder %v360_v7, %v1398_v11  ;;  %vm431_vm8 = vcmp.eq.s32.totalorder %v361_v8, %v1398_v11  ;;  %vm448_vm10 = vcmp.eq.s32.totalorder %v378_v9, %v1398_v11 }
  0x7b   : > { %902 = vmatprep.subr.msk.bf16.mxu0 %vm901_vm4, %v1154_v14  ;;  %vm903_vm9 = vmpackc.low %vm429_vm3, %vm428_vm2  ;;  %vm449_vm11 = vcmp.eq.s32.totalorder %v379_v10, %v1398_v11  ;;  %v380_v15 = vadd.s32 176, %v1383_v1  ;;  %v381_v16 = vadd.s32 184, %v1383_v1  ;;  %v364_v17 = vadd.s32 48, %v1383_v1 }
  0x7c   : > { %904 = vmatpush3.bf16.msk.msra.mxu0 %vm903_vm9, %v1154_v14  ;;  %vm905_vm12 = vmpackc.low %vm447_vm6, %vm446_vm5  ;;  %vm432_vm15 = vcmp.eq.s32.totalorder %v362_v12, %v1398_v11  ;;  %vm433_vm0 = vcmp.eq.s32.totalorder %v363_v13, %v1398_v11  ;;  %v365_v18 = vadd.s32 56, %v1383_v1  ;;  %v382_v19 = vadd.s32 192, %v1383_v1 }
  0x7d   : > { %906 = vmatprep.subr.msk.bf16.mxu0 %vm905_vm12, %v1154_v14  ;;  %vm907_vm13 = vmpackc.low %vm431_vm8, %vm430_vm7  ;;  %vm450_vm1 = vcmp.eq.s32.totalorder %v380_v15, %v1398_v11  ;;  %vm451_vm2 = vcmp.eq.s32.totalorder %v381_v16, %v1398_v11  ;;  %v383_v20 = vadd.s32 200, %v1383_v1  ;;  %vm434_vm4 = vcmp.eq.s32.totalorder %v364_v17, %v1398_v11 }
  0x7e   : > { %vm909_vm14 = vmpackc.low %vm449_vm11, %vm448_vm10  ;;  %vm435_vm6 = vcmp.eq.s32.totalorder %v365_v18, %v1398_v11  ;;  %vm452_vm7 = vcmp.eq.s32.totalorder %v382_v19, %v1398_v11  ;;  %v366_v22 = vadd.s32 64, %v1383_v1  ;;  %v367_v23 = vadd.s32 72, %v1383_v1 }
  0x7f   : > { %vm911_vm3 = vmpackc.low %vm433_vm0, %vm432_vm15  ;;  %vm453_vm8 = vcmp.eq.s32.totalorder %v383_v20, %v1398_v11  ;;  %v384_v24 = vadd.s32 208, %v1383_v1  ;;  %v385_v25 = vadd.s32 216, %v1383_v1  ;;  %v368_v27 = vadd.s32 80, %v1383_v1 }
  0x80   : > { %908 = vmatpush3.bf16.msk.msra.mxu0 %vm907_vm13, %v1154_v14  ;;  %vm913_vm5 = vmpackc.low %vm451_vm2, %vm450_vm1  ;;  %vm436_vm11 = vcmp.eq.s32.totalorder %v366_v22, %v1398_v11  ;;  %vm437_vm12 = vcmp.eq.s32.totalorder %v367_v23, %v1398_v11  ;;  %v369_v28 = vadd.s32 88, %v1383_v1  ;;  %v386_v29 = vadd.s32 224, %v1383_v1 }
  0x81   : > { %910 = vmatprep.subr.msk.bf16.mxu0 %vm909_vm14, %v1154_v14  ;;  %vm915_vm9 = vmpackc.low %vm435_vm6, %vm434_vm4  ;;  %vm454_vm13 = vcmp.eq.s32.totalorder %v384_v24, %v1398_v11  ;;  %vm455_vm14 = vcmp.eq.s32.totalorder %v385_v25, %v1398_v11  ;;  %v387_v30 = vadd.s32 232, %v1383_v1  ;;  %vm438_vm1 = vcmp.eq.s32.totalorder %v368_v27, %v1398_v11 }
  0x82   : > { %vm917_vm10 = vmpackc.low %vm453_vm8, %vm452_vm7  ;;  %vm439_vm2 = vcmp.eq.s32.totalorder %v369_v28, %v1398_v11  ;;  %v370_v31 = vadd.s32 96, %v1383_v1  ;;  %v371_v32 = vadd.s32 104, %v1383_v1  ;;  %v388_v33 = vadd.s32 240, %v1383_v1 }
  0x83   : > { %vm919_vm15 = vmpackc.low %vm437_vm12, %vm436_vm11  ;;  %vm457_vm4 = vcmp.eq.s32.totalorder %v387_v30, %v1398_v11  ;;  %v389_v34 = vadd.s32 248, %v1383_v1  ;;  %v372_v35 = vadd.s32 112, %v1383_v1  ;;  %v373_v36 = vadd.s32 120, %v1383_v1 }
  0x84   : > { %912 = vmatpush3.bf16.msk.msra.mxu0 %vm911_vm3, %v1154_v14  ;;  %vm921_vm0 = vmpackc.low %vm455_vm14, %vm454_vm13  ;;  %vm456_vm3 = vcmp.eq.s32.totalorder %v386_v29, %v1398_v11  ;;  %vm440_vm7 = vcmp.eq.s32.totalorder %v370_v31, %v1398_v11  ;;  %vm441_vm8 = vcmp.eq.s32.totalorder %v371_v32, %v1398_v11 }
  0x85   : > { %914 = vmatprep.subr.msk.bf16.mxu0 %vm913_vm5, %v1154_v14  ;;  %vm923_vm5 = vmpackc.low %vm439_vm2, %vm438_vm1  ;;  %vm442_vm13 = vcmp.eq.s32.totalorder %v372_v35, %v1398_v11  ;;  %vm443_vm14 = vcmp.eq.s32.totalorder %v373_v36, %v1398_v11  ;;  %vm622_vm1 = vcmask 0  }
  0x86   : > { %vm925_vm6 = vmpackc.low %vm457_vm4, %vm456_vm3 }
  0x87   : > { %vm927_vm11 = vmpackc.low %vm441_vm8, %vm440_vm7 }
  0x88   : > { %916 = vmatpush3.bf16.msk.msra.mxu0 %vm915_vm9, %v1154_v14  ;;  %vm458_vm9 = vcmp.eq.s32.totalorder %v388_v33, %v1398_v11 }
  0x89   : > { %918 = vmatprep.subr.msk.bf16.mxu0 %vm917_vm10, %v1154_v14  ;;  %vm459_vm10 = vcmp.eq.s32.totalorder %v389_v34, %v1398_v11 }
  0x8a   : > { %vm929_vm12 = vmpackc.low %vm459_vm10, %vm458_vm9 }
  0x8c   : > { %920 = vmatpush3.bf16.msk.msra.mxu0 %vm919_vm15, %v1154_v14  ;;  %vm931_vm15 = vmpackc.low %vm443_vm14, %vm442_vm13 }
  0x8d   : > { %922 = vmatprep.subr.msk.bf16.mxu0 %vm921_vm0, %v1154_v14  ;;  %vm354_vm0 = vcmask 60416  }
  0x8e   : > { %355 = vst.msk [vmem:[#allocation2] sm:$0xf] %vm354_vm0, %v1155_v37  ;;  %v624_v50 = vsel %vm354_vm0, %v605_v44, 0.0 }
  0x90   : > { %924 = vmatpush3.bf16.msk.msra.mxu0 %vm923_vm5, %v1154_v14 }
  0x91   : > { %926 = vmatprep.subr.msk.bf16.mxu0 %vm925_vm6, %v1154_v14 }
  0x94   : > { %928 = vmatpush3.bf16.msk.msra.mxu0 %vm927_vm11, %v1154_v14 }
  0x95   : > { %930 = vmatprep.subr.msk.bf16.mxu0 %vm929_vm12, %v1154_v14  ;;  %v524_v39 = vld [vmem:[#allocation2] sm:$0xf] }
  0x98   : > { %932 = vmatpush3.bf16.msk.msra.mxu0 %vm931_vm15, %v1154_v14 }
  0x9b   : > { %594 = vmatmul.mubr.f32.vlgmr.msra.gmra.mrb[0].mxu0 %v525_v21 }
 0x16e   : > { %v898_v38 = vpop.f32.mrb[0].mxu0 }
 0x16f   : > { %v899_v40 = vpop.f32.mrb[1].mxu0 }
 0x170   : > { %v900_v41 = vadd.f32 %v899_v40, %v898_v38 }
 0x172   : > { %v599_v42 = vadd.f32 %v900_v41, %v524_v39 }
 0x174   : > { %601 = vst.msk [vmem:[#allocation2] sm:$0xf] %vm354_vm0, %v599_v42 }
 0x17b   : > { %v606_v45 = vld [vmem:[#allocation2] sm:$0xf] }
 0x17c   : > { %v608_v46 = vsub.f32 %v606_v45, %v607_v43 }
 0x17e   : > { %v609_v47 = vmul.f32 %v608_v46, %v605_v44 }
 0x180   : > { %v610_v48 = vand.u32 2147483647, %v609_v47 }
 0x182   : > { %v611_v49 = vsel %vm354_vm0, %v610_v48, 0.0 }
 0x183   : > { %612 = vadd.xlane.f32.xlu0 %v611_v49 }
 0x187   : > { %625 = vadd.xlane.f32.xlu0 %v624_v50 }
 0x210   : > { %v613_v51 = vpop.xlane.xlu0 %612 }
 0x211   : > { %v614_v52 = vrot.slane %v613_v51, 4 }
 0x213   : > { %v615_v53 = vadd.f32 %v614_v52, %v613_v51 }
 0x214   : > { %v626_v54 = vpop.xlane.xlu0 %625 }
 0x215   : > { %v616_v55 = vrot.slane %v615_v53, 2  ;;  %v627_v56 = vrot.slane %v626_v54, 4 }
 0x217   : > { %v628_v57 = vadd.f32 %v627_v56, %v626_v54  ;;  %v617_v58 = vadd.f32 %v616_v55, %v615_v53 }
 0x219   : > { %v629_v59 = vrot.slane %v628_v57, 2  ;;  %v618_v60 = vrot.slane %v617_v58, 1 }
 0x21b   : > { %v630_v61 = vadd.f32 %v629_v59, %v628_v57  ;;  %v619_v62 = vadd.f32 %v618_v60, %v617_v58 }
 0x21d   : > { %933 = vpush %v619_v62  ;;  %v631_v63 = vrot.slane %v630_v61, 1 }
 0x21f   : > { %v632_v0 = vadd.f32 %v631_v63, %v630_v61 }
 0x221   : > { %935 = vpush %v632_v0 }
 0x24e   : > { %s934_s24 = spop %933 }
 0x24f   : > { %v621_v1 = vstv %s934_s24 }
 0x250   : > { %623 = vst.msk [vmem:[%s346_s30] sm:$0x1] %vm622_vm1, %v621_v1 }
 0x252   : > { %s936_s17 = spop %935 }
 0x253   : > { %v634_v2 = vstv %s936_s17 }
 0x254   : > { %635 = vst.msk [vmem:[%s349_s27] sm:$0x1] %vm622_vm1, %v634_v2 }
 0x255 PF: > { %s22_s23 = sadd.s32 1, %s1149_s23   ;;  %s1526_s8 = sld [smem:[#allocation10_spill]] }
 0x256   : > { %p19_p1 = scmp.ge.s32.totalorder %s22_s23, 4   ;;  %s1527_s18 = smov %s1133_s19 }
 0x257   : > { %s1528_s19 = smov %s1137_s20  ;;  %s1529_s20 = smov %s1233_s29 }
 0x258   : > { %s1530_s21 = smov %s1145_s22  ;;  %21 = sbr.rel (!%p19_p1) target bundleno = 8 (0x8), region = 123 }
 0x25b   : > { %s1531_s22 = smov %s1526_s8 }
 0x25f   :  { %665 = vsyncpa [#allocation4], 1 }
 0x260   :  { %667 = vsyncpa [#allocation4 + $0x1], 1 }
 0x261   :  { %668 = vsyncpa [#allocation6], 1 }
 0x262   :  { %670 = vsyncpa [#allocation6 + $0x1], 1 }

</bundles_post_ra>
